<compile_context>
chip_gen: v6e
topology: v6e:2x2x1
jax: 0.10.0
libtpu: 0.0.40
codegen_flags: <defaults>
</compile_context>

<pallas_src>
import math

import jax
import jax.numpy as jnp
import numpy as np
from jax.experimental import pallas as pl
from jax.experimental.pallas import tpu as pltpu


def _round_up(x, m):
    return (x + m - 1) // m * m


def _make_arcface_kernel(scale, margin, easy_margin):
    """Kernel body with the (compile-time) ArcFace hyper-params baked in."""
    cos_m = math.cos(margin)
    sin_m = math.sin(margin)
    theta = math.cos(math.pi - margin)
    sinmm = math.sin(math.pi - margin) * margin

    def kernel(emb_ref, w_ref, inv_en_ref, inv_wn_ref, plab_ref,
               out_ref, otgt_ref):
        j = pl.program_id(1)          # C-tile index (inner axis)
        tc = out_ref.shape[1]

        # Init the per-row original-target accumulator at the first C tile.
        @pl.when(j == 0)
        def _():
            otgt_ref[...] = jnp.zeros_like(otgt_ref)

        # MXU matmul on bf16 operands, f32 accumulation.  L2 normalization is
        # folded into a post-matmul scaling by the precomputed 1/norm factors.
        cos = jnp.dot(emb_ref[...], w_ref[...],
                      preferred_element_type=jnp.float32)
        cos = cos * inv_en_ref[...] * inv_wn_ref[...]
        cos = jnp.clip(cos, -1.0, 1.0)

        # Target-column mask for this C tile (shard-local labels; -1 = none).
        plab = plab_ref[...]                                   # (TB, 1) i32
        local_col = plab - j * tc                              # tile-local col
        col_ids = jax.lax.broadcasted_iota(jnp.int32, cos.shape, 1)
        tgt_mask = jnp.logical_and(col_ids == local_col, plab >= 0)

        # Gather the per-row target logit (0 for rows whose target is not in
        # this tile) and run the margin math on the (TB, 1) vector only.
        tgt = jnp.sum(jnp.where(tgt_mask, cos, 0.0), axis=1, keepdims=True)
        sin_t = jnp.sqrt(jnp.maximum(1.0 - tgt * tgt, 0.0))
        cos_t_m = tgt * cos_m - sin_t * sin_m
        if easy_margin:
            final_t = jnp.where(tgt > 0.0, cos_t_m, tgt)
        else:
            final_t = jnp.where(tgt > theta, cos_t_m, tgt - sinmm)

        # Scatter the modified target back and scale (single (TB, TC) write).
        out_ref[...] = jnp.where(tgt_mask, final_t, cos) * scale

        # Accumulate the (scaled) original target logit; exactly one C tile
        # contributes a non-zero value per in-shard row.
        otgt_ref[...] += tgt * scale

    return kernel


def arcface_forward(embeddings, labels, kernel_shard, shard_start, shard_end,
                    scale=64.0, margin=0.5, easy_margin=False):
    """embeddings: (B, D) f32, labels: (B,) i32, kernel_shard: (D, C) f32."""
    B, D = embeddings.shape
    D_w, C = kernel_shard.shape
    assert D_w == D

    # ---------------- wrapper-side prep (hoisted out of the kernel) --------
    emb_f32 = embeddings.astype(jnp.float32)
    w_f32 = kernel_shard.astype(jnp.float32)
    labels = labels.reshape(-1).astype(jnp.int32)

    in_shard = jnp.logical_and(labels >= shard_start, labels < shard_end)
    part_labels = jnp.where(in_shard, labels - shard_start, -1)       # (B,)

    eps = 1e-12  # guards zero rows / zero (padded) columns against NaN
    inv_en = 1.0 / jnp.maximum(
        jnp.sqrt(jnp.sum(emb_f32 * emb_f32, axis=1, keepdims=True)), eps)   # (B,1)
    inv_wn = 1.0 / jnp.maximum(
        jnp.sqrt(jnp.sum(w_f32 * w_f32, axis=0, keepdims=True)), eps)       # (1,C)

    # ---------------- tile / pad geometry ----------------------------------
    D_pad = _round_up(max(D, 128), 128)                 # lane-dense contraction dim
    TC = min(_round_up(max(C, 128), 128), 512)          # 128-aligned class tile
    C_pad = _round_up(max(C, TC), TC)
    B_pad = _round_up(max(B, 16), 16)                   # bf16 sublane friendly
    if B_pad <= 256:
        TB = B_pad
    else:
        TB = 256
        B_pad = _round_up(B_pad, TB)
    nb, nc = B_pad // TB, C_pad // TC

    # bf16 operands for the MXU (weight streaming is the dominant HBM traffic).
    emb_p = jnp.zeros((B_pad, D_pad), jnp.bfloat16).at[:B, :D].set(
        emb_f32.astype(jnp.bfloat16))
    w_p = jnp.zeros((D_pad, C_pad), jnp.bfloat16).at[:D, :C].set(
        w_f32.astype(jnp.bfloat16))
    inv_en_p = jnp.zeros((B_pad, 1), jnp.float32).at[:B].set(inv_en)
    inv_wn_p = jnp.zeros((1, C_pad), jnp.float32).at[:, :C].set(inv_wn)
    plab_p = jnp.full((B_pad, 1), -1, jnp.int32).at[:B, 0].set(part_labels)

    grid_spec = pltpu.PrefetchScalarGridSpec(
        num_scalar_prefetch=0,
        grid=(nb, nc),                                  # C (revisit) axis last
        in_specs=[
            pl.BlockSpec((TB, D_pad), lambda i, j: (i, 0)),  # embeddings (resident over j)
            # NOTE: bump to pipeline_mode=pl.Buffered(3) if the weight DMA is
            # still exposed after tiling (check VMEM budget on v7x first).
            pl.BlockSpec((D_pad, TC), lambda i, j: (0, j)),  # weight shard (streamed)
            pl.BlockSpec((TB, 1), lambda i, j: (i, 0)),      # 1/||emb_row||
            pl.BlockSpec((1, TC), lambda i, j: (0, j)),      # 1/||w_col||
            pl.BlockSpec((TB, 1), lambda i, j: (i, 0)),      # shard-local labels
        ],
        out_specs=[
            pl.BlockSpec((TB, TC), lambda i, j: (i, j)),     # modified logits * scale
            pl.BlockSpec((TB, 128), lambda i, j: (i, 0)),    # original target * scale
        ],
    )

    out_shapes = (
        jax.ShapeDtypeStruct((B_pad, C_pad), jnp.float32),
        jax.ShapeDtypeStruct((B_pad, 128), jnp.float32),
    )

    cos_p, otgt_p = pl.pallas_call(
        _make_arcface_kernel(scale, margin, easy_margin),
        out_shape=out_shapes,
        grid_spec=grid_spec,
        compiler_params=pltpu.CompilerParams(
            # B tiles are independent -> "parallel" (v7x megacore); the C axis
            # carries the per-row original-target accumulator -> "arbitrary".
            dimension_semantics=("parallel", "arbitrary"),
            vmem_limit_bytes=48 * 1024 * 1024,
        ),
    )(emb_p, w_p, inv_en_p, inv_wn_p, plab_p)

    cos_out = cos_p[:B, :C]              # cos_theta (margin applied) * scale
    orig_tgt = otgt_p[:B, :1]            # original target logit * scale, (B, 1)

    # Reconstruct the full "original_logits * scale" matrix (module semantics);
    # callers that only need the per-target original value can use orig_tgt and
    # skip this full-size where().
    col = jnp.arange(C, dtype=jnp.int32)[None, :]
    mask = jnp.logical_and(col == part_labels[:, None], part_labels[:, None] >= 0)
    orig_out = jnp.where(mask, orig_tgt, cos_out)

    return cos_out, part_labels.reshape(-1, 1), orig_out


def arcface_reference(embeddings, labels, kernel_shard, shard_start, shard_end,
                      scale=64.0, margin=0.5, easy_margin=False):
    """Pure-JAX f32 reference mirroring the PyTorch forward."""
    cos_m = math.cos(margin)
    sin_m = math.sin(margin)
    theta = math.cos(math.pi - margin)
    sinmm = math.sin(math.pi - margin) * margin

    emb_n = embeddings / jnp.linalg.norm(embeddings, axis=1, keepdims=True)
    w_n = kernel_shard / jnp.linalg.norm(kernel_shard, axis=0, keepdims=True)
    cos = jnp.clip(emb_n @ w_n, -1.0, 1.0)
    orig = cos
    part_labels = jnp.where((labels >= shard_start) & (labels < shard_end),
                            labels - shard_start, -1)
    col = jnp.arange(cos.shape[1])[None, :]
    mask = (col == part_labels[:, None]) & (part_labels[:, None] >= 0)
    target = cos
    sin = jnp.sqrt(jnp.maximum(1.0 - target * target, 0.0))
    cos_tm = target * cos_m - sin * sin_m
    if easy_margin:
        final = jnp.where(target > 0.0, cos_tm, target)
    else:
        final = jnp.where(target > theta, cos_tm, target - sinmm)
    cos_out = jnp.where(mask, final, cos) * scale
    return cos_out, part_labels.reshape(-1, 1), orig * scale


if __name__ == "__main__":
    # Small deterministic config (same as the torch module's sharded head).
    B = 8                        # batch
    IN_FEATURES = 32             # embedding dim
    CLASS_SPLIT = (16, 16, 32)   # class shards across "gpus"
    GPU_INDEX = 1
    shard_starts = [0]
    acc = 0
    for c in CLASS_SPLIT:
        acc += c
        shard_starts.append(acc)
    SHARD_START = shard_starts[GPU_INDEX]
    SHARD_END = shard_starts[GPU_INDEX + 1]
    TOTAL_CLASSES = sum(CLASS_SPLIT)

    key = jax.random.PRNGKey(0)
    k_emb, k_w, k_lab = jax.random.split(key, 3)
    embeddings = jax.random.normal(k_emb, (B, IN_FEATURES), dtype=jnp.float32)
    weight_init = jax.random.normal(k_w, (IN_FEATURES, TOTAL_CLASSES),
                                    dtype=jnp.float32)
    # CommonFace.__init__: select this shard's columns of weight_init.
    kernel_shard = weight_init[:, SHARD_START:SHARD_END]
    labels = jax.random.randint(k_lab, (B,), 0, TOTAL_CLASSES, dtype=jnp.int32)

    cos_out, part_labels, orig_out = arcface_forward(
        embeddings, labels, kernel_shard, SHARD_START, SHARD_END)
    jax.block_until_ready((cos_out, part_labels, orig_out))

    ref_cos, ref_plab, ref_orig = arcface_reference(
        embeddings, labels, kernel_shard, SHARD_START, SHARD_END)

    # bf16 MXU operands -> relaxed tolerance on the scaled (x64) logits.
    np.testing.assert_allclose(np.asarray(cos_out), np.asarray(ref_cos),
                               rtol=2e-2, atol=0.5)
    np.testing.assert_array_equal(np.asarray(part_labels), np.asarray(ref_plab))
    np.testing.assert_allclose(np.asarray(orig_out), np.asarray(ref_orig),
                               rtol=2e-2, atol=0.5)

    print("KERNEL_OK")
</pallas_src>

<mosaic_0001>
module attributes {stable_mosaic.version = 11 : i64} {
  func.func @kernel(%arg0: i32, %arg1: i32, %arg2: memref<16x128xbf16, #tpu.memory_space<vmem>>, %arg3: memref<128x128xbf16, #tpu.memory_space<vmem>>, %arg4: memref<16x1xf32, #tpu.memory_space<vmem>>, %arg5: memref<1x128xf32, #tpu.memory_space<vmem>>, %arg6: memref<16x1xi32, #tpu.memory_space<vmem>>, %arg7: memref<16x128xf32, #tpu.memory_space<vmem>>, %arg8: memref<16x128xf32, #tpu.memory_space<vmem>>) attributes {dimension_semantics = [#tpu.dimension_semantics<parallel>, #tpu.dimension_semantics<arbitrary>], iteration_bounds = array<i64: 1, 1>, scalar_prefetch = 0 : i64, scratch_operands = 0 : i64, tpu.core_type = #tpu.core_type<tc>, window_params = [{transform_indices = @transform_0, window_bounds = array<i64: 16, 128>}, {transform_indices = @transform_1, window_bounds = array<i64: 128, 128>}, {transform_indices = @transform_2, window_bounds = array<i64: 16, 1>}, {transform_indices = @transform_3, window_bounds = array<i64: 1, 128>}, {transform_indices = @transform_4, window_bounds = array<i64: 16, 1>}, {transform_indices = @transform_5, window_bounds = array<i64: 16, 128>}, {transform_indices = @transform_6, window_bounds = array<i64: 16, 128>}]} {
    %c0_i32 = arith.constant 0 : i32
    %0 = arith.cmpi eq, %arg1, %c0_i32 : i32
    %1 = arith.extui %0 : i1 to i32
    %c0_i32_0 = arith.constant 0 : i32
    %2 = arith.cmpi ne, %1, %c0_i32_0 : i32
    scf.if %2 {
      %cst_29 = arith.constant 0.000000e+00 : f32
      %59 = vector.broadcast %cst_29 : f32 to vector<16x128xf32>
      %c0_30 = arith.constant 0 : index
      %c0_31 = arith.constant 0 : index
      %60 = vector.load %arg8[%c0_30, %c0_31] : memref<16x128xf32, #tpu.memory_space<vmem>>, vector<16x128xf32>
      tpu.vector_store %arg8[%c0_30, %c0_31], %59 {strides = array<i32>} : memref<16x128xf32, #tpu.memory_space<vmem>>, vector<16x128xf32>,
    } else {
    }
    %c0 = arith.constant 0 : index
    %c0_1 = arith.constant 0 : index
    %3 = vector.load %arg2[%c0, %c0_1] : memref<16x128xbf16, #tpu.memory_space<vmem>>, vector<16x128xbf16>
    %c0_2 = arith.constant 0 : index
    %c0_3 = arith.constant 0 : index
    %4 = vector.load %arg3[%c0_2, %c0_3] : memref<128x128xbf16, #tpu.memory_space<vmem>>, vector<128x128xbf16>
    %cst = arith.constant dense<0.000000e+00> : vector<16x128xf32>
    %5 = tpu.matmul %3, %4, %cst {dimension_numbers = #tpu.dot_dimension_numbers<[1], [0], [0], [1], [0, 0, 1, 1], [], []>} : vector<16x128xbf16>, vector<128x128xbf16>, vector<16x128xf32> -> vector<16x128xf32>
    %c0_4 = arith.constant 0 : index
    %c0_5 = arith.constant 0 : index
    %6 = vector.load %arg4[%c0_4, %c0_5] : memref<16x1xf32, #tpu.memory_space<vmem>>, vector<16x1xf32>
    %7 = vector.broadcast %6 : vector<16x1xf32> to vector<16x128xf32>
    %8 = arith.mulf %5, %7 : vector<16x128xf32>
    %c0_6 = arith.constant 0 : index
    %c0_7 = arith.constant 0 : index
    %9 = vector.load %arg5[%c0_6, %c0_7] : memref<1x128xf32, #tpu.memory_space<vmem>>, vector<1x128xf32>
    %10 = vector.broadcast %9 : vector<1x128xf32> to vector<16x128xf32>
    %11 = arith.mulf %8, %10 : vector<16x128xf32>
    %cst_8 = arith.constant -1.000000e+00 : f32
    %cst_9 = arith.constant 1.000000e+00 : f32
    %12 = vector.broadcast %cst_8 : f32 to vector<16x128xf32>
    %13 = arith.maximumf %12, %11 : vector<16x128xf32>
    %14 = vector.broadcast %cst_9 : f32 to vector<16x128xf32>
    %15 = arith.minimumf %14, %13 : vector<16x128xf32>
    %c0_10 = arith.constant 0 : index
    %c0_11 = arith.constant 0 : index
    %16 = vector.load %arg6[%c0_10, %c0_11] : memref<16x1xi32, #tpu.memory_space<vmem>>, vector<16x1xi32>
    %c128_i32 = arith.constant 128 : i32
    %17 = arith.muli %arg1, %c128_i32 : i32
    %18 = vector.broadcast %17 : i32 to vector<16x1xi32>
    %19 = arith.subi %16, %18 : vector<16x1xi32>
    %20 = tpu.iota {dimensions = array<i32: 1>} : vector<16x128xi32>
    %21 = vector.broadcast %19 : vector<16x1xi32> to vector<16x128xi32>
    %22 = arith.cmpi eq, %20, %21 : vector<16x128xi32>
    %c0_i32_12 = arith.constant 0 : i32
    %23 = vector.broadcast %c0_i32_12 : i32 to vector<16x1xi32>
    %24 = arith.cmpi sge, %16, %23 : vector<16x1xi32>
    %25 = vector.broadcast %24 : vector<16x1xi1> to vector<16x128xi1>
    %26 = arith.andi %22, %25 : vector<16x128xi1>
    %cst_13 = arith.constant 0.000000e+00 : f32
    %27 = vector.broadcast %cst_13 : f32 to vector<16x128xf32>
    %28 = arith.select %26, %15, %27 : vector<16x128xi1>, vector<16x128xf32>
    %cst_14 = arith.constant dense<0.000000e+00> : vector<16xf32>
    %29 = vector.multi_reduction <add>, %28, %cst_14 [1] : vector<16x128xf32> to vector<16xf32>
    %30 = vector.shape_cast %29 : vector<16xf32> to vector<16x1xf32>
    %31 = arith.mulf %30, %30 : vector<16x1xf32>
    %cst_15 = arith.constant 1.000000e+00 : f32
    %32 = vector.broadcast %cst_15 : f32 to vector<16x1xf32>
    %33 = arith.subf %32, %31 : vector<16x1xf32>
    %cst_16 = arith.constant 0.000000e+00 : f32
    %34 = vector.broadcast %cst_16 : f32 to vector<16x1xf32>
    %35 = arith.maximumf %33, %34 : vector<16x1xf32>
    %36 = math.sqrt %35 : vector<16x1xf32>
    %cst_17 = arith.constant 0.87758255 : f32
    %37 = vector.broadcast %cst_17 : f32 to vector<16x1xf32>
    %38 = arith.mulf %30, %37 : vector<16x1xf32>
    %cst_18 = arith.constant 0.47942555 : f32
    %39 = vector.broadcast %cst_18 : f32 to vector<16x1xf32>
    %40 = arith.mulf %36, %39 : vector<16x1xf32>
    %41 = arith.subf %38, %40 : vector<16x1xf32>
    %cst_19 = arith.constant -0.87758255 : f32
    %42 = vector.broadcast %cst_19 : f32 to vector<16x1xf32>
    %43 = arith.cmpf ogt, %30, %42 : vector<16x1xf32>
    %cst_20 = arith.constant 0.239712775 : f32
    %44 = vector.broadcast %cst_20 : f32 to vector<16x1xf32>
    %45 = arith.subf %30, %44 : vector<16x1xf32>
    %46 = arith.select %43, %41, %45 : vector<16x1xi1>, vector<16x1xf32>
    %47 = vector.shape_cast %46 : vector<16x1xf32> to vector<16x1xf32>
    %48 = vector.broadcast %47 : vector<16x1xf32> to vector<16x128xf32>
    %49 = arith.select %26, %48, %15 : vector<16x128xi1>, vector<16x128xf32>
    %cst_21 = arith.constant 6.400000e+01 : f32
    %50 = vector.broadcast %cst_21 : f32 to vector<16x128xf32>
    %51 = arith.mulf %49, %50 : vector<16x128xf32>
    %c0_22 = arith.constant 0 : index
    %c0_23 = arith.constant 0 : index
    %52 = vector.load %arg7[%c0_22, %c0_23] : memref<16x128xf32, #tpu.memory_space<vmem>>, vector<16x128xf32>
    tpu.vector_store %arg7[%c0_22, %c0_23], %51 {strides = array<i32>} : memref<16x128xf32, #tpu.memory_space<vmem>>, vector<16x128xf32>,
    %c0_24 = arith.constant 0 : index
    %c0_25 = arith.constant 0 : index
    %53 = vector.load %arg8[%c0_24, %c0_25] : memref<16x128xf32, #tpu.memory_space<vmem>>, vector<16x128xf32>
    %cst_26 = arith.constant 6.400000e+01 : f32
    %54 = vector.broadcast %cst_26 : f32 to vector<16x1xf32>
    %55 = arith.mulf %30, %54 : vector<16x1xf32>
    %56 = vector.broadcast %55 : vector<16x1xf32> to vector<16x128xf32>
    %57 = arith.addf %53, %56 : vector<16x128xf32>
    %c0_27 = arith.constant 0 : index
    %c0_28 = arith.constant 0 : index
    %58 = vector.load %arg8[%c0_27, %c0_28] : memref<16x128xf32, #tpu.memory_space<vmem>>, vector<16x128xf32>
    tpu.vector_store %arg8[%c0_27, %c0_28], %57 {strides = array<i32>} : memref<16x128xf32, #tpu.memory_space<vmem>>, vector<16x128xf32>,
    return
  }
  func.func @transform_0(%arg0: i32, %arg1: i32) -> (i32, i32) {
    %c0_i32 = arith.constant 0 : i32
    %c0_i32_0 = arith.constant 0 : i32
    return %arg0, %c0_i32 : i32, i32
  }
  func.func @transform_1(%arg0: i32, %arg1: i32) -> (i32, i32) {
    %c0_i32 = arith.constant 0 : i32
    %c0_i32_0 = arith.constant 0 : i32
    return %c0_i32, %arg1 : i32, i32
  }
  func.func @transform_2(%arg0: i32, %arg1: i32) -> (i32, i32) {
    %c0_i32 = arith.constant 0 : i32
    %c0_i32_0 = arith.constant 0 : i32
    return %arg0, %c0_i32 : i32, i32
  }
  func.func @transform_3(%arg0: i32, %arg1: i32) -> (i32, i32) {
    %c0_i32 = arith.constant 0 : i32
    %c0_i32_0 = arith.constant 0 : i32
    return %c0_i32, %arg1 : i32, i32
  }
  func.func @transform_4(%arg0: i32, %arg1: i32) -> (i32, i32) {
    %c0_i32 = arith.constant 0 : i32
    %c0_i32_0 = arith.constant 0 : i32
    return %arg0, %c0_i32 : i32, i32
  }
  func.func @transform_5(%arg0: i32, %arg1: i32) -> (i32, i32) {
    %c0_i32 = arith.constant 0 : i32
    return %arg0, %arg1 : i32, i32
  }
  func.func @transform_6(%arg0: i32, %arg1: i32) -> (i32, i32) {
    %c0_i32 = arith.constant 0 : i32
    %c0_i32_0 = arith.constant 0 : i32
    return %arg0, %c0_i32 : i32, i32
  }
}

</mosaic_0001>

<bundles_post_ra>
// kernel: tpu_custom_call.1
= control target key start
LH: loop header
LB: loop body
LE: loop exit
PB: predicated region body
PF: predicated region fallthrough
CT: control target
= control target key end

     0   :  { %12 = vsyncpa [#allocation3], 0  ;;  %s538_s0 = inlined_call_operand.vmem [shape: bf16[16,128], index: 0, kind: input, shape index: {}]   ;;  %s539_s1 = inlined_call_operand.hbm [shape: bf16[128,128], index: 1, kind: input, shape index: {}]   ;;  %s540_s2 = inlined_call_operand.vmem [shape: f32[16,1], index: 2, kind: input, shape index: {}]   ;;  %s541_s3 = inlined_call_operand.vmem [shape: f32[1,128], index: 3, kind: input, shape index: {}]   ;;  %s542_s4 = inlined_call_operand.vmem [shape: s32[16,1], index: 4, kind: input, shape index: {}]   ;;  %s543_s5 = inlined_call_operand.hbm [shape: f32[16,128], index: 5, kind: output, shape index: {0}]   ;;  %s544_s6 = inlined_call_operand.hbm [shape: f32[16,128], index: 6, kind: output, shape index: {1}]  }
   0x1   :  { %13 = vsyncpa [#allocation4], 0 }
   0x2   :  { %14 = vsyncpa [#allocation7], 0  ;;  %s434_s21 = smov [#allocation2]  }
   0x3   :  { %s22_s22 = sshll.u32 %s434_s21, 4  ;;  %s23_s22 = int_to_ptr.vmem [resolvable:$true] %s22_s22 }
   0x4   :  { %s376_s23 = scalar_lea.vmem %s23_s22, 1024  ;;  %p381_p1 = scmp.lt.s32.totalorder %s23_s22, %s23_s22 }
   0x5   :  { %p377_p0 = scmp.ne.s32.totalorder %s23_s22, %s376_s23  ;;  %p382_p2 = scmp.lt.s32.totalorder %s376_s23, %s376_s23 }
   0x7   :  { %p383_p3 = por %p382_p2, %p381_p1 }
   0x9   :  { %p384_p4 = pnand %p383_p3, %p377_p0 }
   0xb   :  { %387 = shalt.err (!%p384_p4)
}
   0xc   :  { %s435_s24 = smov 64   ;;  %s436_s25 = smov 4  }
   0xd   :  { %28 = dma.hbm_to_vmem [thread:$0]  %s539_s1, 1024, %s23_s22, [#allocation3], %s435_s24, %s435_s24, %s436_s25  }
   0xe   :  { %428 = dma.done.wait [#allocation3], 1024  }
   0xf   :  { %429 = vsyncadd [#allocation3], 4294966272  ;;  %v437_v0 = vmov 0.0   ;;  %vm438_vm0 = vmmov 0   ;;  %v439_v1 = vmov 0   ;;  %v355_v2 = vld [vmem:[#allocation2 + $0x38] sm:$0xff]   ;;  %v191_v20 = vlaneseq }
  0x10   :  { %323 = vmatprep.subr.bf16.mxu0 %v437_v0  ;;  %339 = vmatprep.mubr.msk.bf16.mxu0 %vm438_vm0, %v437_v0  ;;  %v356_v3 = vld [vmem:[#allocation2 + $0x30] sm:$0xff]   ;;  %v357_v4 = vld [vmem:[#allocation2 + $0x28] sm:$0xff]   ;;  %v185_v5 = vld [vmem:[%s542_s4] sm:$0xff] }
  0x11   :  { %354 = vset.pattern.permute.xlu1 %v439_v1  ;;  %353 = vset.pattern.permute.xlu0 %v439_v1  ;;  %v158_v6 = vld [vmem:[%s540_s2] sm:$0xff]  ;;  %v186_v8 = vld [vmem:[%s542_s4 + $0x8] sm:$0xff]  ;;  %vm201_vm2 = vcmp.ge.s32.totalorder %v185_v5, 0  ;;  %v359_v10 = vld [vmem:[#allocation2 + $0x18] sm:$0xff]   ;;  %v192_v22 = vand.u32 127, %v191_v20 }
  0x12   :  { %324 = vmatpush3.bf16.msra.mxu0 %v355_v2  ;;  %v358_v7 = vld [vmem:[#allocation2 + $0x20] sm:$0xff]   ;;  %194 = vperm.xlu1 %354, %v185_v5   ;;  %v159_v9 = vld [vmem:[%s540_s2 + $0x8] sm:$0xff]  ;;  %vm202_vm1 = vcmp.ge.s32.totalorder %v186_v8, 0  ;;  %v203_v12 = vsel %vm201_vm2, 1, %v439_v1  ;;  %v360_v13 = vld [vmem:[#allocation2 + $0x10] sm:$0xff]  }
  0x13   :  { %325 = vmatprep.subr.bf16.mxu0 %v437_v0  ;;  %162 = vperm.xlu0 %353, %v158_v6   ;;  %v204_v11 = vsel %vm202_vm1, 1, %v439_v1  ;;  %v361_v14 = vld [vmem:[#allocation2 + $0x8] sm:$0xff]   ;;  %v362_v15 = vld [vmem:[#allocation2] sm:$0xff]  }
  0x14   :  { %v363_v16 = vld [vmem:[%s538_s0] sm:$0xff]   ;;  %s440_s0 = smov [#allocation6]  }
  0x15   :  { %v309_v25 = vld [vmem:[%s541_s3] ss:$0 sm:$0xff]  ;;  %s284_s3 = sshll.u32 %s440_s0, 4  ;;  %s285_s3 = int_to_ptr.vmem [resolvable:$true] %s284_s3 }
  0x16   :  { %326 = vmatpush3.bf16.msra.mxu0 %v356_v3  ;;  %197 = vperm.xlu1 %354, %v186_v8   ;;  %s388_s13 = scalar_lea.vmem %s285_s3, 256  ;;  %p393_p6 = scmp.lt.s32.totalorder %s285_s3, %s285_s3 }
  0x17   :  { %327 = vmatprep.subr.bf16.mxu0 %v437_v0  ;;  %167 = vperm.xlu0 %353, %v159_v9   ;;  %p389_p5 = scmp.ne.s32.totalorder %s285_s3, %s388_s13  ;;  %p394_p7 = scmp.lt.s32.totalorder %s388_s13, %s388_s13 }
  0x19   :  { %p395_p8 = por %p394_p7, %p393_p6 }
  0x1a   :  { %328 = vmatpush3.bf16.msra.mxu0 %v357_v4  ;;  %209 = vperm.xlu1 %354, %v204_v11  }
  0x1b   :  { %329 = vmatprep.subr.bf16.mxu0 %v437_v0  ;;  %206 = vperm.xlu0 %353, %v203_v12   ;;  %p396_p9 = pnand %p395_p8, %p389_p5 }
  0x1e   :  { %330 = vmatpush3.bf16.msra.mxu0 %v358_v7 }
  0x1f   :  { %331 = vmatprep.subr.bf16.mxu0 %v437_v0 }
  0x22   :  { %332 = vmatpush3.bf16.msra.mxu0 %v359_v10 }
  0x23   :  { %333 = vmatprep.subr.bf16.mxu0 %v437_v0 }
  0x26   :  { %334 = vmatpush3.bf16.msra.mxu0 %v360_v13 }
  0x27   :  { %335 = vmatprep.subr.bf16.mxu0 %v437_v0 }
  0x2a   :  { %336 = vmatpush3.bf16.msra.mxu0 %v361_v14 }
  0x2b   :  { %337 = vmatprep.subr.bf16.mxu0 %v437_v0 }
  0x2e   :  { %338 = vmatpush3.bf16.msra.mxu0 %v362_v15 }
  0x31   :  { %340 = vmatmul.mubr.bf16.vlgmr.msra.gmra.mxu0 %v363_v16 }
  0x8d   :  { %v195_v18 = vpop.permute.xlu1 %194 }
  0x8e   :  { %v163_v17 = vpop.permute.xlu0 %162  ;;  %vm199_vm3 = vcmp.eq.s32.totalorder %v192_v22, %v195_v18 }
  0x91   :  { %v198_v21 = vpop.permute.xlu1 %197 }
  0x92   :  { %v168_v19 = vpop.permute.xlu0 %167  ;;  %vm200_vm6 = vcmp.eq.s32.totalorder %v192_v22, %v198_v21 }
  0x95   :  { %v210_v29 = vpop.permute.xlu1 %209 }
  0x96   :  { %v207_v23 = vpop.permute.xlu0 %206  ;;  %vm212_vm7 = vcmp.eq.s32.totalorder %v210_v29, 1 }
  0x97   :  { %vm211_vm4 = vcmp.eq.s32.totalorder %v207_v23, 1  ;;  %vm512_vm8 = vmand %vm200_vm6, %vm212_vm7 }
  0x98   :  { %vm503_vm5 = vmand %vm199_vm3, %vm211_vm4 }
  0xf1   :  { %v151_v24 = vpop.f32.mrf.mxu0 }
  0xf2   :  { %v170_v26 = vmul.f32 %v163_v17, %v151_v24 }
  0xf3   :  { %v341_v27 = vpop.f32.mrf.mxu0 }
  0xf4   :  { %v500_v28 = vmul.f32 %v309_v25, %v170_v26 }
  0xf5   :  { %v154_v30 = vpop.f32.mrf.mxu0 }
  0xf6   :  { %v171_v31 = vmul.f32 %v168_v19, %v154_v30  ;;  %v310_v32 = vclamps-f32 %v500_v28, 1.0 }
  0xf7   :  { %v342_v33 = vpop.f32.mrf.mxu0 }
  0xf8   :  { %v507_v35 = vmul.f32 %v309_v25, %v171_v31  ;;  %v215_v36 = vsel %vm503_vm5, %v310_v32, 0.0 }
  0xf9   :  { %217 = vadd.xlane.f32.xlu0 %v215_v36 }
  0xfa   :  { %v311_v37 = vclamps-f32 %v507_v35, 1.0 }
  0xfc   :  { %v216_v39 = vsel %vm512_vm8, %v311_v37, 0.0 }
  0xfd   :  { %219 = vadd.xlane.f32.xlu1 %v216_v39 }
 0x182   :  { %v218_v40 = vpop.xlane.xlu0 %217 }
 0x183   :  { %v221_v41 = vmul.f32 %v218_v40, %v218_v40  ;;  %v261_v42 = vmul.f32 64.0, %v218_v40 }
 0x185   :  { %v223_v43 = vsub.f32 1.0, %v221_v41  ;;  %265 = vst [vmem:[#allocation6] sm:$0xff] %v261_v42 }
 0x186   :  { %v220_v44 = vpop.xlane.xlu1 %219 }
 0x187   :  { %v225_v45 = vmax.f32 %v223_v43, 0.0  ;;  %v222_v46 = vmul.f32 %v220_v44, %v220_v44  ;;  %v262_v47 = vmul.f32 64.0, %v220_v44 }
 0x189   :  { %364 = vrsqrt.f32 %v225_v45  ;;  %v224_v48 = vsub.f32 1.0, %v222_v46  ;;  %266 = vst [vmem:[#allocation6 + $0x8] sm:$0xff] %v262_v47 }
 0x18b   :  { %v226_v49 = vmax.f32 %v224_v48, 0.0 }
 0x18c   :  { %399 = shalt.err (!%p396_p9)
}
 0x18d   :  { %s441_s14 = smov 128   ;;  %s442_s15 = smov 8   ;;  %366 = vrsqrt.f32 %v226_v49  ;;  %vm229_vm9 = vcmp.eq.f32.partialorder %v225_v45, inf  ;;  %v232_v52 = vand.u32 2147483648, %v225_v45  ;;  %vm231_vm10 = vcmp.eq.f32.partialorder %v225_v45, 0.0 }
 0x18e   :  { %290 = dma.vmem_to_hbm [thread:$0]  %s285_s3, 256, %s544_s6, [#allocation7], %s441_s14, %s441_s14, %s442_s15   ;;  %v241_v56 = vmul.f32 0.87758255, %v218_v40  ;;  %v312_v60 = vadd.f32 -0.23971277, %v218_v40 }
 0x18f   :  { %vm236_vm11 = vcmp.eq.f32.partialorder %v226_v49, inf  ;;  %v239_v61 = vand.u32 2147483648, %v226_v49  ;;  %vm247_vm12 = vcmp.gt.f32.partialorder %v218_v40, -0.87758255  ;;  %vm238_vm13 = vcmp.eq.f32.partialorder %v226_v49, 0.0  ;;  %s443_s6 = smov [#allocation5]  }
 0x190   :  { %v242_v2 = vmul.f32 0.87758255, %v220_v44  ;;  %v313_v6 = vadd.f32 -0.23971277, %v220_v44  ;;  %vm248_vm14 = vcmp.gt.f32.partialorder %v220_v44, -0.87758255 }
 0x191   :  { %s272_s18 = sshll.u32 %s443_s6, 4  ;;  %s273_s18 = int_to_ptr.vmem [resolvable:$true] %s272_s18 }
 0x192   :  { %s408_s19 = scalar_lea.vmem %s273_s18, 256  ;;  %p413_p11 = scmp.lt.s32.totalorder %s273_s18, %s273_s18 }
 0x193   :  { %p409_p10 = scmp.ne.s32.totalorder %s273_s18, %s408_s19  ;;  %p414_p12 = scmp.lt.s32.totalorder %s408_s19, %s408_s19 }
 0x195   :  { %p415_p13 = por %p414_p12, %p413_p11 }
 0x196   :  { %v365_v50 = vpop.eup %364 }
 0x197   :  { %v228_v51 = vmul.f32 %v365_v50, %v225_v45  ;;  %p416_p0 = pnand %p415_p13, %p409_p10 }
 0x199   :  { %v230_v53 = vsel %vm229_vm9, %v225_v45, %v228_v51 }
 0x19a   :  { %v233_v54 = vsel %vm231_vm10, %v232_v52, %v230_v53  ;;  %v367_v55 = vpop.eup %366 }
 0x19b   :  { %v243_v57 = vmul.f32 0.47942555, %v233_v54  ;;  %v235_v58 = vmul.f32 %v367_v55, %v226_v49 }
 0x19d   :  { %v245_v59 = vsub.f32 %v241_v56, %v243_v57  ;;  %v237_v62 = vsel %vm236_vm11, %v226_v49, %v235_v58 }
 0x19e   :  { %v240_v0 = vsel %vm238_vm13, %v239_v61, %v237_v62 }
 0x19f   :  { %v251_v63 = vsel %vm247_vm12, %v245_v59, %v312_v60  ;;  %v244_v3 = vmul.f32 0.47942555, %v240_v0 }
 0x1a0   :  { %v253_v1 = vsel %vm503_vm5, %v251_v63, %v310_v32 }
 0x1a1   :  { %v255_v4 = vmul.f32 64.0, %v253_v1  ;;  %v246_v5 = vsub.f32 %v242_v2, %v244_v3 }
 0x1a3   :  { %257 = vst [vmem:[#allocation5] sm:$0xff] %v255_v4  ;;  %v252_v7 = vsel %vm248_vm14, %v246_v5, %v313_v6 }
 0x1a4   :  { %v254_v8 = vsel %vm512_vm8, %v252_v7, %v311_v37 }
 0x1a5   :  { %v256_v9 = vmul.f32 64.0, %v254_v8 }
 0x1a7   :  { %258 = vst [vmem:[#allocation5 + $0x8] sm:$0xff] %v256_v9 }
 0x1a8   :  { %419 = shalt.err (!%p416_p0)
}
 0x1a9   :  { %278 = dma.vmem_to_hbm [thread:$0]  %s273_s18, 256, %s543_s5, [#allocation4], %s441_s14, %s441_s14, %s442_s15  }
 0x1aa   :  { %430 = dma.done.wait [#allocation4], 256  }
 0x1ab   :  { %431 = vsyncadd [#allocation4], 4294967040 }
 0x1ac   :  { %432 = dma.done.wait [#allocation7], 256  }
 0x1ad   :  { %433 = vsyncadd [#allocation7], 4294967040 }
 0x1ae   :  { %297 = vsyncpa [#allocation3], 1 }
 0x1af   :  { %298 = vsyncpa [#allocation4], 1 }
 0x1b0   :  { %299 = vsyncpa [#allocation7], 1 }

</bundles_post_ra>
